<compile_context>
chip_gen: v7x
topology: tpu7x:2x2x1
jax: 0.10.0
libtpu: 0.0.40
codegen_flags: <defaults>
</compile_context>

<pallas_src>
import math

import jax
import jax.numpy as jnp
from jax.experimental import pallas as pl
from jax.experimental.pallas import tpu as pltpu


def _adyolo_kernel(x_ref, wf_ref, bf_ref, o_ref):
    # x_ref : (TM, C), wf_ref : (C, D), bf_ref : (1, D), o_ref : (TM, D)
    out = jnp.dot(x_ref[...], wf_ref[...], preferred_element_type=jnp.float32)
    out = out + bf_ref[...]                      # broadcast (1, D) over rows
    o_ref[...] = out.astype(o_ref.dtype)


def fuse_adyolo_weights(w1, b1, w2, b2):
    """Fuse the two bias-Linears (valid: no activation between fc1 and fc2).

    w1: (C, F), b1: (1, F), w2: (F, D), b2: (1, D) in "x @ W" layout
    (transpose of PyTorch's weight).  Call ONCE per weight update, not per
    forward, so the fusion matmuls stay off the forward critical path.
    """
    hi = jax.lax.Precision.HIGHEST
    wf = jnp.dot(w1, w2, precision=hi).astype(jnp.float32)          # (C, D)
    bf = (jnp.dot(b1, w2, precision=hi) + b2).astype(jnp.float32)   # (1, D)
    return wf, bf


def adyolo_head_forward(x, wf, bf, *, tm=4096, min_pallas_rows=1024,
                        force_pallas=False):
    """x: (B, T, C) float32, wf: (C, D), bf: (1, D) -> (B, T, D) float32."""
    B, T, C = x.shape
    D = wf.shape[1]
    M = B * T
    x2d = x.reshape(M, C)

    # Small-M fast path: a single-tile pallas_call is pure launch/DMA overhead.
    if not force_pallas and M < min_pallas_rows:
        out2d = jnp.dot(x2d, wf, preferred_element_type=jnp.float32) + bf
        return out2d.astype(x.dtype).reshape(B, T, D)

    # Row tile: multiple of 8, at most `tm`, and capped at ~ceil(M/2) so the
    # grid has >=2 steps whenever possible (keeps both v7x TensorCores busy).
    half = pl.cdiv(pl.cdiv(M, 2), 8) * 8
    TM = max(8, min(tm, half))
    grid = (pl.cdiv(M, TM),)          # ragged last tile handled by Pallas

    cost = pl.CostEstimate(
        flops=2 * M * C * D,
        transcendentals=0,
        bytes_accessed=4 * (M * C + C * D + D + M * D),
    )

    out2d = pl.pallas_call(
        _adyolo_kernel,
        out_shape=jax.ShapeDtypeStruct((M, D), x.dtype),
        grid_spec=pltpu.PrefetchScalarGridSpec(
            num_scalar_prefetch=0,
            grid=grid,
            in_specs=[
                pl.BlockSpec((TM, C), lambda i: (i, 0)),   # row tile of x
                pl.BlockSpec((C, D), lambda i: (0, 0)),    # fused weight, VMEM-resident
                pl.BlockSpec((1, D), lambda i: (0, 0)),    # fused bias, VMEM-resident
            ],
            out_specs=pl.BlockSpec((TM, D), lambda i: (i, 0)),
        ),
        compiler_params=pltpu.CompilerParams(
            dimension_semantics=("parallel",),  # v7x: shard row tiles across both TCs
        ),
        cost_estimate=cost,
    )(x2d, wf, bf)

    return out2d.reshape(B, T, D)


def xavier_uniform(key, fan_in, fan_out, dtype=jnp.float32):
    # matches torch.nn.init.xavier_uniform_ (gain=1.0); stored (fan_in, fan_out)
    # so the kernel uses x @ W directly (same math as PyTorch's x @ weight.T).
    limit = math.sqrt(6.0 / (fan_in + fan_out))
    return jax.random.uniform(key, (fan_in, fan_out), dtype=dtype,
                              minval=-limit, maxval=limit)


if __name__ == "__main__":
    # module hyper-parameters (small, consistent with the module's __init__)
    enc_out_dim = 32
    ffn_dim = 64
    nb_classes = 3
    grid_size = (90.0, 90.0)            # -> nb_grids = (4, 2)
    nb_anchors = 2

    nb_grids = (math.ceil(360 / grid_size[0]), math.ceil(180 / grid_size[1]))
    out_dim = nb_grids[0] * nb_grids[1] * nb_anchors * (nb_classes + 3)  # 96

    key = jax.random.PRNGKey(0)
    k_x, k_w1, k_w2, k_x2 = jax.random.split(key, 4)

    # deterministic parameter init (xavier uniform weights, zero biases)
    w1 = xavier_uniform(k_w1, enc_out_dim, ffn_dim)
    b1 = jnp.zeros((1, ffn_dim), dtype=jnp.float32)
    w2 = xavier_uniform(k_w2, ffn_dim, out_dim)
    b2 = jnp.zeros((1, out_dim), dtype=jnp.float32)

    # hoisted weight fusion (done once, not per forward)
    wf, bf = fuse_adyolo_weights(w1, b1, w2, b2)

    def ref_forward(xin):
        hi = jax.lax.Precision.HIGHEST
        Bi, Ti, _ = xin.shape
        h = jnp.dot(xin.reshape(Bi * Ti, enc_out_dim), w1, precision=hi) + b1
        y = jnp.dot(h, w2, precision=hi) + b2
        return y.reshape(Bi, Ti, out_dim)

    # 1) module-sized small input (B=2, T=8), forced through the Pallas kernel
    B, T = 2, 8
    x_small = jax.random.normal(k_x, (B, T, enc_out_dim), dtype=jnp.float32)
    out_small = jax.block_until_ready(
        adyolo_head_forward(x_small, wf, bf, force_pallas=True))
    assert out_small.shape == (B, T, out_dim)
    assert jnp.allclose(out_small, ref_forward(x_small), atol=2e-3, rtol=2e-4)

    # small-M XLA fast path (what a real deployment would hit at this size)
    out_fast = jax.block_until_ready(adyolo_head_forward(x_small, wf, bf))
    assert jnp.allclose(out_fast, ref_forward(x_small), atol=2e-3, rtol=2e-4)

    # 2) multi-tile run with a ragged last tile (M = 8200, not a TM multiple):
    #    exercises the pipelined Pallas path and the OOB tail handling.
    B2, T2 = 2, 4100
    x_big = jax.random.normal(k_x2, (B2, T2, enc_out_dim), dtype=jnp.float32)
    out_big = jax.block_until_ready(adyolo_head_forward(x_big, wf, bf))
    assert out_big.shape == (B2, T2, out_dim)
    assert jnp.allclose(out_big, ref_forward(x_big), atol=2e-3, rtol=2e-4)

    print("KERNEL_OK")
</pallas_src>

<mosaic_0001>
module attributes {stable_mosaic.version = 11 : i64} {
  func.func @_adyolo_kernel(%arg0: i32, %arg1: memref<8x32xf32, #tpu.memory_space<vmem>>, %arg2: memref<32x96xf32, #tpu.memory_space<vmem>>, %arg3: memref<1x96xf32, #tpu.memory_space<vmem>>, %arg4: memref<8x96xf32, #tpu.memory_space<vmem>>) attributes {dimension_semantics = [#tpu.dimension_semantics<parallel>], iteration_bounds = array<i64: 2>, scalar_prefetch = 0 : i64, scratch_operands = 0 : i64, tpu.core_type = #tpu.core_type<tc>, window_params = [{transform_indices = @transform_0, window_bounds = array<i64: 8, 32>}, {pipeline_mode = #tpu.pipeline_mode<synchronous>, transform_indices = @transform_1, window_bounds = array<i64: 32, 96>}, {pipeline_mode = #tpu.pipeline_mode<synchronous>, transform_indices = @transform_2, window_bounds = array<i64: 1, 96>}, {transform_indices = @transform_3, window_bounds = array<i64: 8, 96>}]} {
    %c0 = arith.constant 0 : index
    %c0_0 = arith.constant 0 : index
    %0 = vector.load %arg1[%c0, %c0_0] : memref<8x32xf32, #tpu.memory_space<vmem>>, vector<8x32xf32>
    %c0_1 = arith.constant 0 : index
    %c0_2 = arith.constant 0 : index
    %1 = vector.load %arg2[%c0_1, %c0_2] : memref<32x96xf32, #tpu.memory_space<vmem>>, vector<32x96xf32>
    %cst = arith.constant dense<0.000000e+00> : vector<8x96xf32>
    %2 = tpu.matmul %0, %1, %cst {dimension_numbers = #tpu.dot_dimension_numbers<[1], [0], [0], [1], [0, 0, 1, 1], [], []>} : vector<8x32xf32>, vector<32x96xf32>, vector<8x96xf32> -> vector<8x96xf32>
    %c0_3 = arith.constant 0 : index
    %c0_4 = arith.constant 0 : index
    %3 = vector.load %arg3[%c0_3, %c0_4] : memref<1x96xf32, #tpu.memory_space<vmem>>, vector<1x96xf32>
    %4 = vector.broadcast %3 : vector<1x96xf32> to vector<8x96xf32>
    %5 = arith.addf %2, %4 : vector<8x96xf32>
    %c0_5 = arith.constant 0 : index
    %c0_6 = arith.constant 0 : index
    %6 = vector.load %arg4[%c0_5, %c0_6] : memref<8x96xf32, #tpu.memory_space<vmem>>, vector<8x96xf32>
    tpu.vector_store %arg4[%c0_5, %c0_6], %5 {strides = array<i32>} : memref<8x96xf32, #tpu.memory_space<vmem>>, vector<8x96xf32>,
    return
  }
  func.func @transform_0(%arg0: i32) -> (i32, i32) {
    %c0_i32 = arith.constant 0 : i32
    %c0_i32_0 = arith.constant 0 : i32
    return %arg0, %c0_i32 : i32, i32
  }
  func.func @transform_1(%arg0: i32) -> (i32, i32) {
    %c0_i32 = arith.constant 0 : i32
    %c0_i32_0 = arith.constant 0 : i32
    %c0_i32_1 = arith.constant 0 : i32
    return %c0_i32, %c0_i32_0 : i32, i32
  }
  func.func @transform_2(%arg0: i32) -> (i32, i32) {
    %c0_i32 = arith.constant 0 : i32
    %c0_i32_0 = arith.constant 0 : i32
    %c0_i32_1 = arith.constant 0 : i32
    return %c0_i32, %c0_i32_0 : i32, i32
  }
  func.func @transform_3(%arg0: i32) -> (i32, i32) {
    %c0_i32 = arith.constant 0 : i32
    %c0_i32_0 = arith.constant 0 : i32
    return %arg0, %c0_i32 : i32, i32
  }
}

</mosaic_0001>

<bundles_post_ra>
// kernel: tpu_custom_call.1
= control target key start
LH: loop header
LB: loop body
LE: loop exit
PB: predicated region body
PF: predicated region fallthrough
CT: control target
= control target key end

     0   :  { %8 = vsyncpa [#allocation3], 0  ;;  %s840_s0 = inlined_call_operand.hbm [shape: f32[16,32], index: 0, kind: input, shape index: {}]   ;;  %s841_s1 = inlined_call_operand.hbm [shape: f32[32,96], index: 1, kind: input, shape index: {}]   ;;  %s842_s2 = inlined_call_operand.vmem [shape: f32[1,96], index: 2, kind: input, shape index: {}]   ;;  %s843_s3 = inlined_call_operand.hbm [shape: f32[16,96], index: 3, kind: output, shape index: {}]  }
   0x1   :  { %10 = vsyncpa [#allocation3 + $0x1], 0 }
   0x2   :  { %11 = vsyncpa [#allocation6], 0 }
   0x3   :  { %12 = vsyncpa [#allocation4], 0 }
   0x4   :  { %14 = vsyncpa [#allocation4 + $0x1], 0  ;;  %s641_s12 = smov 0   ;;  %s643_s13 = smov 0  }
   0x5   :  { %s645_s14 = smov 0   ;;  %s647_s15 = smov 0  }
   0x6 LB: > { %s662_s16 = sadd.s32 4294967295, %s611_s15   ;;  %s383_s17 = sadd.s32 4294967294, %s611_s15   ;;  %s611_s15 = sphi %s647_s15, %s863_s15   ;;  %s607_s14 = sphi %s645_s14, %s862_s14   ;;  %s603_s13 = sphi %s643_s13, %s861_s13   ;;  %s599_s12 = sphi %s641_s12, %s860_s12  }
   0x7   : > { %p40_p0 = scmp.ne.s32.totalorder %s603_s13, %s599_s12  ;;  %p844_p1 = scmp.eq.s32.totalorder %s662_s16, 0 }
   0x8   : > { %p112_p3 = scmp.eq.s32.totalorder %s383_s17, 1  ;;  %p384_p5 = scmp.ge.s32.totalorder %s611_s15, 1 }
   0x9   : > { %p671_p4 = por %p844_p1, %p40_p0  ;;  %p119_p7 = scmp.lt.s32.totalorder %s611_s15, 3 }
   0xa   : > { %p676_p6 = por %p112_p3, %p40_p0  ;;  %s613_s21 = smov [#allocation5]  }
   0xb   : > { %s847_s18 = scalar_select %p671_p4, 1, 0 }
   0xc   : > { %s848_s19 = scalar_select %p676_p6, 1, 0 }
   0xd   : > { %p681_p8 = pnand %p384_p5, %p119_p7  ;;  %s131_s22 = sshll.u32 %s613_s21, 4  ;;  %s685_s22 = int_to_ptr.vmem [resolvable:$true] %s131_s22 }
   0xe   : > { %s697_s24 = sadd.s32 1, %s611_s15   ;;  %s27_s25 = sadd.s32 1, %s607_s14 }
   0xf   : > { %s849_s20 = scalar_select %p681_p8, 1, 0 }
  0x10   : > { %p429_p9 = pneg %p681_p8  ;;  %s24_s26 = ssub.s32 %s611_s15, %s697_s24 }
  0x11   : > { %s483_s29 = scalar_lea.hbm %s841_s1, 512 }
  0x12   : > { %p692_p11 = pnand %p429_p9, %p844_p1  ;;  %p484_p12 = scmp.ne.s32.totalorder %s841_s1, %s483_s29 }
  0x13   : > { %p490_p5 = scmp.lt.u32.totalorder %s483_s29, %s841_s1 }
  0x14   : > { %p485_p13 = pneg %p692_p11 }
  0x16   : > { %p486_p0 = pnand %p485_p13, %p484_p12 }
  0x18   : > { %p487_p3 = pneg %p486_p0 }
  0x1a   : > { %p492_p7 = pnand %p490_p5, %p487_p3 }
  0x1c   : > { %495 = shalt.err (!%p492_p7)
}
  0x1d   : > { %s496_s7 = scalar_lea.vmem %s685_s22, 512  ;;  %p504_p2 = scmp.lt.s32.totalorder %s685_s22, %s685_s22 }
  0x1e   : > { %p497_p9 = scmp.ne.s32.totalorder %s685_s22, %s496_s7  ;;  %p505_p6 = scmp.lt.s32.totalorder %s496_s7, %s496_s7 }
  0x20   : > { %p499_p10 = pnand %p497_p9, %p485_p13  ;;  %p506_p4 = por %p505_p6, %p504_p2 }
  0x22   : > { %p500_p1 = pneg %p499_p10 }
  0x24   : > { %p507_p8 = pnand %p506_p4, %p500_p1 }
  0x26   : > { %510 = shalt.err (!%p507_p8)
}
  0x27   : > { %s614_s8 = smov 128   ;;  %s615_s9 = smov 8  }
  0x28   : > { %432 = dma.hbm_to_vmem [thread:$0]  (!%p692_p11), %s841_s1, 512, %s685_s22, [#allocation6], %s614_s8, %s614_s8, %s615_s9  }
  0x29   : > { %p25_p2 = scmp.eq.s32.totalorder %s24_s26, 0  ;;  %p34_p1 = scmp.ne.s32.totalorder %s607_s14, %s603_s13 }
  0x2a   : > { %p35_p4 = scmp.eq.s32.totalorder %s611_s15, 0  ;;  %p442_p6 = scmp.lt.s32.totalorder %s611_s15, 2 }
  0x2b   : > { %s728_s17 = scalar_select %p25_p2, %s607_s14, %s27_s25  }
  0x2c   : > { %p36_p8 = por %p35_p4, %p34_p1  ;;  %p851_p10 = scmp.eq.s32.totalorder %s662_s16, 1 }
  0x2d   : > { %s148_s27 = sand.u32 1, %s607_s14   ;;  %s388_s28 = sshll.u32 %s611_s15, 7 }
  0x2e   : > { %p732_p12 = por %p851_p10, %p34_p1  ;;  %s387_s29 = sshll.u32 %s148_s27, 3 }
  0x2f   : > { %s741_s4 = scalar_lea.hbm %s840_s0, %s388_s28  ;;  %s152_s22 = scalar_lea.vmem [#allocation2], %s387_s29 }
  0x30   : > { %s159_s25 = sshll.u32 %s152_s22, 4  ;;  %p743_p11 = pnand %p442_p6, %p36_p8  ;;  %s747_s25 = int_to_ptr.vmem [resolvable:$true] %s159_s25 }
  0x31   : > { %s149_s5 = scalar_lea.sflag [#allocation3], %s148_s27  ;;  %s511_s6 = scalar_lea.hbm %s741_s4, 128 }
  0x32   : > { %p512_p13 = scmp.ne.s32.totalorder %s741_s4, %s511_s6  ;;  %p513_p0 = pneg %p743_p11 }
  0x33   : > { %s516_s9 = scalar_lea.hbm %s840_s0, 256  ;;  %p517_p7 = scmp.lt.u32.totalorder %s741_s4, %s840_s0 }
  0x34   : > { %p514_p3 = pnand %p513_p0, %p512_p13  ;;  %p518_p9 = scmp.lt.u32.totalorder %s516_s9, %s511_s6 }
  0x35   : > { %p520_p1 = scmp.lt.u32.totalorder %s511_s6, %s741_s4 }
  0x36   : > { %p515_p5 = pneg %p514_p3  ;;  %p519_p2 = por %p518_p9, %p517_p7 }
  0x38   : > { %p521_p4 = por %p520_p1, %p519_p2 }
  0x3a   : > { %p522_p6 = pnand %p521_p4, %p515_p5 }
  0x3c   : > { %525 = shalt.err (!%p522_p6)
}
  0x3d   : > { %s526_s27 = scalar_lea.vmem %s747_s25, 128  ;;  %s616_s28 = smov [#allocation2]  }
  0x3e   : > { %p527_p8 = scmp.ne.s32.totalorder %s747_s25, %s526_s27  ;;  %s531_s29 = sshll.u32 %s616_s28, 4  ;;  %s532_s29 = int_to_ptr.vmem [resolvable:$false] %s531_s29 }
  0x3f   : > { %s533_s23 = scalar_lea.vmem %s532_s29, 256  ;;  %p534_p3 = scmp.lt.s32.totalorder %s747_s25, %s532_s29 }
  0x40   : > { %p529_p10 = pnand %p527_p8, %p513_p0  ;;  %p535_p7 = scmp.lt.s32.totalorder %s533_s23, %s526_s27 }
  0x42   : > { %p530_p13 = pneg %p529_p10  ;;  %p536_p9 = por %p535_p7, %p534_p3 }
  0x44   : > { %p537_p2 = pnand %p536_p9, %p530_p13 }
  0x46   : > { %540 = shalt.err (!%p537_p2)
}
  0x47   : > { %436 = dma.hbm_to_vmem [thread:$0]  (!%p743_p11), %s741_s4, 128, %s747_s25, %s149_s5  }
  0x48   : > { %p854_p5 = scmp.ne.s32.totalorder %s849_s20, 0 }
  0x49   : > { %s777_s30 = sand.u32 (!%p854_p5), 1, %s603_s13   ;;  %p855_p0 = scmp.ne.s32.totalorder (!%p854_p5), %s847_s18, 0 }
  0x4a   : > { %168 = sbr.rel (%p854_p5) target bundleno = 323 (0x143), region = 32  ;;  %s390_s22 = sshll.u32 (!%p854_p5), %s777_s30, 3 }
  0x4b   : > { %s171_s6 = scalar_lea.sflag (!%p854_p5), [#allocation3], %s777_s30  ;;  %s174_s7 = scalar_lea.vmem (!%p854_p5), [#allocation2], %s390_s22 }
  0x51   : > { %586 = dma.done.wait (%p855_p0), %s171_s6, 128  }
  0x52   : > { %588 = vsyncadd (%p855_p0), %s171_s6, 4294967168  ;;  %p856_p1 = scmp.eq.s32.totalorder %s662_s16, 0 }
  0x54   : > { %590 = dma.done.wait (%p856_p1), [#allocation6], 512   ;;  %p857_p11 = pmov %p856_p1 }
  0x55   : > { %v617_v0 = vmov 0.0|0.0   ;;  %vm618_vm0 = vmmov 0   ;;  %v619_v1 = vmov 0.0   ;;  %v202_v2 = vld [vmem:[#allocation5] sm:$0xff]  ;;  %v203_v3 = vld [vmem:[#allocation5 + $0x8] sm:$0xff]  ;;  %v204_v4 = vld [vmem:[#allocation5 + $0x10] sm:$0xff] }
  0x56   : > { %592 = vsyncadd (%p857_p11), [#allocation6], 4294966784  ;;  %415 = vmatprep.subr.bf16.mxu0 %v617_v0  ;;  %412 = vmatprep.mubr.msk.f32.mxu0 %vm618_vm0, %v619_v1  ;;  %v416_v5 = vpack.c.bf16 %v203_v3, %v202_v2  ;;  %v205_v6 = vld [vmem:[#allocation5 + $0x18] sm:$0xff]  ;;  %vm213_vm1 = vcmask 261120   ;;  %v393_v9 = vld [vmem:[%s842_s2] ss:$0 sm:$0xff] }
  0x57   : > { %v419_v7 = vpack.c.bf16 %v205_v6, %v204_v4  ;;  %v201_v8 = vld [vmem:[%s174_s7] sm:$0xff]  ;;  %s396_s4 = sshll.u32 %s662_s16, 7  ;;  %s200_s25 = scalar_lea.vmem [#allocation7], %s390_s22  ;;  %vm287_vm2 = vcmask 785408  }
  0x58   : > { %417 = vmatpush3.bf16.msra.mxu0 %v416_v5  ;;  %s303_s26 = sshll.u32 %s200_s25, 4  ;;  %s796_s9 = scalar_lea.hbm %s843_s3, %s396_s4  ;;  %s798_s26 = int_to_ptr.vmem [resolvable:$true] %s303_s26 }
  0x59   : > { %418 = vmatprep.subr.bf16.mxu0 %v617_v0  ;;  %s290_s10 = scalar_lea.sflag [#allocation4], %s777_s30  ;;  %s541_s11 = scalar_lea.vmem %s798_s26, 128 }
  0x5a   : > { %p542_p4 = scmp.ne.s32.totalorder %s798_s26, %s541_s11  ;;  %s620_s16 = smov [#allocation7]  }
  0x5b   : > { %s545_s27 = sshll.u32 %s620_s16, 4  ;;  %s546_s27 = int_to_ptr.vmem [resolvable:$false] %s545_s27 }
  0x5c   : > { %420 = vmatpush3.bf16.msra.mxu0 %v419_v7  ;;  %p543_p6 = pnand %p542_p4, %p732_p12  ;;  %s547_s28 = scalar_lea.vmem %s546_s27, 256 }
  0x5d   : > { %p548_p10 = scmp.lt.s32.totalorder %s798_s26, %s546_s27  ;;  %p549_p13 = scmp.lt.s32.totalorder %s547_s28, %s541_s11 }
  0x5e   : > { %p544_p8 = pneg %p543_p6 }
  0x5f   : > { %413 = vmatmul.mubr.msk.f32.vlgmr.msra.gmra.mrb[0].mxu0 %vm213_vm1, %v201_v8  ;;  %p550_p3 = por %p549_p13, %p548_p10 }
  0x61   : > { %p551_p7 = pnand %p550_p3, %p544_p8 }
 0x132   : > { %v283_v10 = vpop.f32.mrb[0].mxu0 }
 0x133   : > { %v284_v11 = vadd.f32 %v393_v9, %v283_v10  ;;  %v414_v12 = vpop.f32.mrb[1].mxu0 }
 0x135   : > { %288 = vst.msk [vmem:[%s200_s25] sm:$0xff] %vm287_vm2, %v284_v11 }
 0x136   : > { %554 = shalt.err (!%p551_p7)
}
 0x137   : > { %s555_s29 = scalar_lea.hbm %s796_s9, 128  ;;  %s559_s22 = scalar_lea.hbm %s843_s3, 256 }
 0x138   : > { %p556_p9 = scmp.ne.s32.totalorder %s796_s9, %s555_s29  ;;  %p560_p0 = scmp.lt.u32.totalorder %s796_s9, %s843_s3 }
 0x139   : > { %p561_p1 = scmp.lt.u32.totalorder %s559_s22, %s555_s29  ;;  %p563_p4 = scmp.lt.u32.totalorder %s555_s29, %s796_s9 }
 0x13a   : > { %p557_p2 = pnand %p556_p9, %p732_p12 }
 0x13b   : > { %p562_p11 = por %p561_p1, %p560_p0 }
 0x13c   : > { %p558_p5 = pneg %p557_p2 }
 0x13d   : > { %p564_p6 = por %p563_p4, %p562_p11 }
 0x13f   : > { %p565_p8 = pnand %p564_p6, %p558_p5 }
 0x141   : > { %568 = shalt.err (!%p565_p8)
}
 0x142   : > { %427 = dma.vmem_to_hbm [thread:$0]  (%p732_p12), %s798_s26, 128, %s796_s9, %s290_s10  }
 0x143 PF: > { %s315_s18 = sand.u32 1, %s599_s12   ;;  %p858_p10 = scmp.ne.s32.totalorder %s848_s19, 0 }
 0x144   : > { %p859_p13 = scmp.ge.s32.totalorder %s611_s15, 2  ;;  %s316_s20 = scalar_lea.sflag [#allocation4], %s315_s18 }
 0x146   : > { %p438_p3 = pnand %p859_p13, %p858_p10 }
 0x148   : > { %594 = dma.done.wait (!%p438_p3), %s316_s20, 128  }
 0x149   : > { %596 = vsyncadd (!%p438_p3), %s316_s20, 4294967168  ;;  %p17_p7 = scmp.ge.s32.totalorder %s697_s24, 4   ;;  %s860_s12 = smov %s603_s13 }
 0x14a   : > { %s861_s13 = smov %s607_s14  ;;  %s862_s14 = smov %s728_s17 }
 0x14b   : > { %s863_s15 = smov %s697_s24  ;;  %19 = sbr.rel (!%p17_p7) target bundleno = 6 (0x6), region = 81 }
 0x152   :  { %321 = vsyncpa [#allocation3], 1 }
 0x153   :  { %323 = vsyncpa [#allocation3 + $0x1], 1 }
 0x154   :  { %324 = vsyncpa [#allocation6], 1 }
 0x155   :  { %325 = vsyncpa [#allocation4], 1 }
 0x156   :  { %327 = vsyncpa [#allocation4 + $0x1], 1 }

</bundles_post_ra>
